<compile_context>
chip_gen: v5e
topology: v5e:2x2
jax: 0.10.0
libtpu: 0.0.40
codegen_flags: <defaults>
</compile_context>

<pallas_src>
import functools

import jax
import jax.numpy as jnp
import numpy as np
from jax.experimental import pallas as pl
from jax.experimental.pallas import tpu as pltpu


# ----------------------------------------------------------------------------
# Hardware-aware defaults (v5e/v6e: 128 MiB VMEM, v7x: 64 MiB per TensorCore).
# ----------------------------------------------------------------------------
def _vmem_capacity_bytes() -> int:
    try:
        return int(pltpu.get_tpu_info().vmem_capacity_bytes)
    except Exception:
        return 64 * 1024 * 1024  # conservative default (v7x per-core VMEM)


# ----------------------------------------------------------------------------
# Kernel: cast one (B?, C, BH, WT) tile and paste the patch window into it.
# Grid layout: axis 0 = column tile (outer), axis 1 = row tile, [axis 2 = batch].
# ----------------------------------------------------------------------------
def _make_paste_kernel(*, x, y, w, h, BH, WT, k0, nb, row_base, col_base, fold_b):
    def kernel(inp_ref, paste_ref, out_ref):
        c = pl.program_id(0)                 # column-tile index on the grid
        t = pl.program_id(1)                 # row-tile index on the grid
        col_tile = col_base + c              # absolute column-tile index in the image
        row_tile = row_base + t              # absolute row-tile index in the image

        # (C, BH, WT) window of the resident paste band for this tile.  The column tile
        # is already selected by the paste BlockSpec; only the (sublane) row window is
        # sliced here, at a BH-aligned offset.  Tiles outside the band clamp to an
        # arbitrary in-band window -- they are fully masked off below.
        if nb == 1:
            paste_tile = paste_ref[...]
        else:
            brt = jnp.clip(row_tile - k0, 0, nb - 1)
            r_off = pl.multiple_of(brt * BH, BH)
            paste_tile = paste_ref[:, pl.ds(r_off, BH), :]

        # Factored window mask: (1,BH,1) row iota AND (1,1,WT) col iota (broadcast).
        rows = row_tile * BH + jax.lax.broadcasted_iota(jnp.int32, (1, BH, 1), 1)
        cols = col_tile * WT + jax.lax.broadcasted_iota(jnp.int32, (1, 1, WT), 2)
        inside = (rows >= y) & (rows < y + h) & (cols >= x) & (cols < x + w)

        src = inp_ref[...].astype(out_ref.dtype)   # in-kernel cast (no-op for f32)
        if fold_b:
            out_ref[...] = jnp.where(inside[None], paste_tile[None], src)
        else:
            out_ref[...] = jnp.where(inside, paste_tile, src)

    return kernel


# ----------------------------------------------------------------------------
# Driver: paste `patch` (float32, (C,h,w)) into inputs[..., y:y+h, x:x+w] -> float32.
# ----------------------------------------------------------------------------
def _paste_patch(inputs, patch, *, x, y, w, h, band_rows=None):
    B, C, H, W = inputs.shape
    assert patch.shape == (C, h, w)
    assert 0 <= x and x + w <= W and 0 <= y and y + h <= H

    # float32 inputs: alias the input buffer to the output and visit only the row/col
    # tiles that intersect the patch; untouched pixels are never DMA'd at all.
    # Other dtypes (e.g. uint8 pixels) need the full-image cast -> full grid, no alias.
    band_only = inputs.dtype == jnp.float32

    # ---- column plan: 128-wide lane tiles restricted to the patch column window.
    if W % 128 == 0 and W > 128:
        WT = 128
        cb0 = x // WT
        ncw = (x + w - 1) // WT - cb0 + 1
        nct_full = W // WT
    else:                               # tiny / non-128-aligned W: full-width blocks
        WT, cb0, ncw, nct_full = W, 0, 1, 1

    # ---- generation-aware VMEM budget and row-tile height.
    vmem_cap = _vmem_capacity_bytes()
    budget = max(16 * 1024 * 1024, (vmem_cap * 5) // 8)  # ~40 MiB (v7x), ~80 MiB (v5e/v6e)
    if band_rows is None:
        band_rows = 256 if vmem_cap <= 64 * 1024 * 1024 else 512
    in_itemsize = inputs.dtype.itemsize

    def working_set(bh, fold):
        blk_b = B if fold else 1
        io = 2 * blk_b * C * bh * WT * (in_itemsize + 4)   # double-buffered in+out tiles
        paste = 2 * C * (h + 2 * bh) * WT * 4              # paste column block (x2 buffers)
        return io + paste

    def clamp_bh(bh0, fold):
        bh = min(bh0, H)
        if bh < H:
            bh = max(8, (bh // 8) * 8)
        while bh > 8 and working_set(bh, fold) > budget:
            bh = max(8, ((bh // 2) // 8) * 8)
        return bh

    fold_b = True                        # fold batch into the block (bigger per-step DMAs,
    BH = clamp_bh(band_rows, fold_b)     # 2-D grid); fall back to a batch grid axis only
    if working_set(BH, fold_b) > budget and B > 1:   # if the folded working set won't fit.
        fold_b = False
        BH = clamp_bh(band_rows, fold_b)

    k0 = y // BH                         # first / number of row tiles touching the patch
    nb = (y + h - 1) // BH - k0 + 1
    nrt_full = -(-H // BH)

    # ---- compact, tile-grid-aligned paste band (band rows x patch column band only).
    paste_band = jnp.zeros((C, nb * BH, ncw * WT), jnp.float32)
    paste_band = paste_band.at[:, y - k0 * BH:y - k0 * BH + h,
                               x - cb0 * WT:x - cb0 * WT + w].set(patch)

    row_base, col_base = (k0, cb0) if band_only else (0, 0)
    n_row, n_col = (nb, ncw) if band_only else (nrt_full, nct_full)

    kernel = _make_paste_kernel(x=x, y=y, w=w, h=h, BH=BH, WT=WT, k0=k0, nb=nb,
                                row_base=row_base, col_base=col_base, fold_b=fold_b)

    def paste_col_idx(c):
        # Paste column block for image column tile (col_base + c); identity on the
        # band-only grid, clipped on the full-image grid (masked off in-kernel there).
        return jnp.clip(c + (col_base - cb0), 0, ncw - 1)

    paste_block = (C, nb * BH, WT)
    if fold_b:
        grid = (n_col, n_row)
        io_block = (B, C, BH, WT)
        io_map = lambda c, t: (0, 0, row_base + t, col_base + c)
        paste_map = lambda c, t: (0, 0, paste_col_idx(c))
    else:
        grid = (n_col, n_row, B)
        io_block = (None, C, BH, WT)
        io_map = lambda c, t, b: (b, 0, row_base + t, col_base + c)
        paste_map = lambda c, t, b: (0, 0, paste_col_idx(c))

    return pl.pallas_call(
        kernel,
        out_shape=jax.ShapeDtypeStruct((B, C, H, W), jnp.float32),
        grid=grid,
        in_specs=[pl.BlockSpec(io_block, io_map),
                  pl.BlockSpec(paste_block, paste_map)],
        out_specs=pl.BlockSpec(io_block, io_map),
        # Alias inputs -> input_adv_255: with donated inputs, untouched pixels are never
        # copied (or, on the band-only path, even read) -- they simply stay in place.
        input_output_aliases=({0: 0} if band_only else {}),
        compiler_params=pltpu.CompilerParams(
            dimension_semantics=("parallel",) * len(grid),
            vmem_limit_bytes=int(budget),
        ),
    )(inputs, paste_band)


# ----------------------------------------------------------------------------
# Full AdversarialComposer forward
# ----------------------------------------------------------------------------
def _composer_forward(inputs, base_255, perturbation, *, x, y, w, h, band_rows):
    C, ph, pw = perturbation.shape
    assert base_255.shape == (C, ph, pw) and (ph, pw) == (h, w)
    # 'perturbation' output is the perturber parameter itself (passthrough);
    # 'patch_perturbed_255' is only C*h*w elements -> plain JAX, computed once.
    patch = jnp.clip(base_255.astype(jnp.float32) + perturbation.astype(jnp.float32),
                     0.0, 255.0)
    adv = _paste_patch(inputs, patch, x=x, y=y, w=w, h=h, band_rows=band_rows)
    return {"perturbation": perturbation,
            "patch_perturbed_255": patch,
            "input_adv_255": adv}


def make_adversarial_composer(*, x, y, w, h, band_rows=None, donate_inputs=True):
    """Jitted AdversarialComposer.forward (returns the full output dict).

    donate_inputs=True donates the `inputs` buffer so the aliased in-place paste needs
    no defensive full-frame copy.  NOTE: unlike the PyTorch module (which clones), the
    caller's `inputs` array is then invalidated after the call; pass False to keep it.
    """
    fn = functools.partial(_composer_forward, x=x, y=y, w=w, h=h, band_rows=band_rows)
    return jax.jit(fn, donate_argnums=(0,) if donate_inputs else ())


# ----------------------------------------------------------------------------
# Deterministic parameter setup (glue, plain JAX)
# ----------------------------------------------------------------------------
def init_perturbation(key, shape, *, init_min=-6.0, init_max=6.0,
                      l2_eps=4423.0, rng_min=-255.0, rng_max=255.0):
    # Uniform(min=-6, max=6, round=True) initializer, then
    # Compose([Lp(p=2, eps=4423), Range(quantize=True, min=-255, max=255)]) projector.
    pert = jnp.round(jax.random.uniform(key, shape, minval=init_min, maxval=init_max))
    norm = jnp.linalg.norm(pert.reshape(-1), ord=2)
    pert = pert * jnp.minimum(1.0, l2_eps / jnp.maximum(norm, 1e-12))
    pert = jnp.clip(jnp.round(pert), rng_min, rng_max)
    return pert.astype(jnp.float32)


def make_base_image(key, shape):
    # TODO(synk): init_image_fpath is not loaded; a deterministic synthetic base image
    # in [0, 255] stands in for the file-backed PertImageBase image.
    return jnp.round(jax.random.uniform(key, shape, minval=0.0, maxval=255.0)).astype(
        jnp.float32)


# ----------------------------------------------------------------------------
# Pure-JAX reference for validation
# ----------------------------------------------------------------------------
def reference(inputs, base_255, perturbation, *, x, y, w, h):
    patch = jnp.clip(base_255.astype(jnp.float32) + perturbation.astype(jnp.float32),
                     0.0, 255.0)
    adv = inputs.astype(jnp.float32)
    adv = adv.at[..., y:y + h, x:x + w].set(patch)
    return perturbation, patch, adv


def _check_case(*, key, B, C, H, W, x, y, w, h, band_rows, donate, in_dtype):
    k_in, k_pert, k_base = jax.random.split(key, 3)
    inputs = jnp.round(jax.random.uniform(k_in, (B, C, H, W), minval=0.0, maxval=255.0))
    inputs = inputs.astype(in_dtype)
    perturbation = init_perturbation(k_pert, (C, h, w))
    base_255 = make_base_image(k_base, (C, h, w))

    # Materialize the reference on host before the (possibly donating) kernel call.
    refs = reference(inputs, base_255, perturbation, x=x, y=y, w=w, h=h)
    ref_pert, ref_patch, ref_adv = (np.asarray(r) for r in refs)

    composer = make_adversarial_composer(x=x, y=y, w=w, h=h, band_rows=band_rows,
                                         donate_inputs=donate)
    outs = composer(inputs, base_255, perturbation)
    jax.block_until_ready(outs)

    np.testing.assert_allclose(np.asarray(outs["perturbation"]), ref_pert)
    np.testing.assert_allclose(np.asarray(outs["patch_perturbed_255"]), ref_patch)
    np.testing.assert_allclose(np.asarray(outs["input_adv_255"]), ref_adv)


if __name__ == "__main__":
    k1, k2, k3, k4 = jax.random.split(jax.random.PRNGKey(0), 4)

    # 1) Band-only aliased + donated path; rows [0, 8) are never visited, exercising
    #    the aliased passthrough of untouched pixels.
    _check_case(key=k1, B=2, C=3, H=16, W=16, x=4, y=8, w=8, h=6,
                band_rows=8, donate=True, in_dtype=jnp.float32)

    # 2) Patch spanning two row tiles (nb=2 -> in-kernel row slice of the resident
    #    paste band); aliasing WITHOUT donation (defensive-copy path, inputs stay valid).
    _check_case(key=k2, B=2, C=3, H=16, W=16, x=4, y=2, w=8, h=12,
                band_rows=8, donate=False, in_dtype=jnp.float32)

    # 3) Lane-tiled column band: W=384 (3x128 tiles), patch covers column tiles 1..2,
    #    so column tile 0 is never visited; folded batch, generation-default band_rows.
    _check_case(key=k3, B=2, C=3, H=32, W=384, x=150, y=6, w=180, h=20,
                band_rows=None, donate=True, in_dtype=jnp.float32)

    # 4) uint8 pixel inputs -> full-image H-tiled grid with in-kernel cast (no alias);
    #    the first row tile lies fully outside the patch window.
    _check_case(key=k4, B=2, C=3, H=64, W=16, x=4, y=40, w=8, h=6,
                band_rows=32, donate=False, in_dtype=jnp.uint8)

    print("KERNEL_OK")
</pallas_src>

<mosaic_0001>
module attributes {stable_mosaic.version = 11 : i64} {
  func.func @kernel(%arg0: i32, %arg1: i32, %arg2: memref<2x3x8x16xf32, #tpu.memory_space<vmem>>, %arg3: memref<3x8x16xf32, #tpu.memory_space<vmem>>, %arg4: memref<2x3x8x16xf32, #tpu.memory_space<vmem>>) attributes {dimension_semantics = [#tpu.dimension_semantics<parallel>, #tpu.dimension_semantics<parallel>], iteration_bounds = array<i64: 1, 1>, scalar_prefetch = 0 : i64, scratch_operands = 0 : i64, tpu.core_type = #tpu.core_type<tc>, window_params = [{transform_indices = @transform_0, window_bounds = array<i64: 2, 3, 8, 16>}, {transform_indices = @transform_1, window_bounds = array<i64: 3, 8, 16>}, {transform_indices = @transform_2, window_bounds = array<i64: 2, 3, 8, 16>}]} {
    %c0_i32 = arith.constant 0 : i32
    %0 = arith.addi %c0_i32, %arg0 : i32
    %c1_i32 = arith.constant 1 : i32
    %1 = arith.addi %c1_i32, %arg1 : i32
    %c0 = arith.constant 0 : index
    %c0_0 = arith.constant 0 : index
    %c0_1 = arith.constant 0 : index
    %2 = vector.load %arg3[%c0, %c0_0, %c0_1] : memref<3x8x16xf32, #tpu.memory_space<vmem>>, vector<3x8x16xf32>
    %c8_i32 = arith.constant 8 : i32
    %3 = arith.muli %1, %c8_i32 : i32
    %4 = tpu.iota {dimensions = array<i32: 1>} : vector<1x8x1xi32>
    %5 = vector.broadcast %3 : i32 to vector<1x8x1xi32>
    %6 = arith.addi %5, %4 : vector<1x8x1xi32>
    %c16_i32 = arith.constant 16 : i32
    %7 = arith.muli %0, %c16_i32 : i32
    %8 = tpu.iota {dimensions = array<i32: 2>} : vector<1x1x16xi32>
    %9 = vector.broadcast %7 : i32 to vector<1x1x16xi32>
    %10 = arith.addi %9, %8 : vector<1x1x16xi32>
    %c8_i32_2 = arith.constant 8 : i32
    %11 = vector.broadcast %c8_i32_2 : i32 to vector<1x8x1xi32>
    %12 = arith.cmpi sge, %6, %11 : vector<1x8x1xi32>
    %c14_i32 = arith.constant 14 : i32
    %13 = vector.broadcast %c14_i32 : i32 to vector<1x8x1xi32>
    %14 = arith.cmpi slt, %6, %13 : vector<1x8x1xi32>
    %15 = arith.andi %12, %14 : vector<1x8x1xi1>
    %c4_i32 = arith.constant 4 : i32
    %16 = vector.broadcast %c4_i32 : i32 to vector<1x1x16xi32>
    %17 = arith.cmpi sge, %10, %16 : vector<1x1x16xi32>
    %18 = vector.broadcast %15 : vector<1x8x1xi1> to vector<1x8x16xi1>
    %19 = vector.broadcast %17 : vector<1x1x16xi1> to vector<1x8x16xi1>
    %20 = arith.andi %18, %19 : vector<1x8x16xi1>
    %c12_i32 = arith.constant 12 : i32
    %21 = vector.broadcast %c12_i32 : i32 to vector<1x1x16xi32>
    %22 = arith.cmpi slt, %10, %21 : vector<1x1x16xi32>
    %23 = vector.broadcast %22 : vector<1x1x16xi1> to vector<1x8x16xi1>
    %24 = arith.andi %20, %23 : vector<1x8x16xi1>
    %c0_3 = arith.constant 0 : index
    %c0_4 = arith.constant 0 : index
    %c0_5 = arith.constant 0 : index
    %c0_6 = arith.constant 0 : index
    %25 = vector.load %arg2[%c0_3, %c0_4, %c0_5, %c0_6] : memref<2x3x8x16xf32, #tpu.memory_space<vmem>>, vector<2x3x8x16xf32>
    %26 = vector.shape_cast %24 : vector<1x8x16xi1> to vector<1x1x8x16xi1>
    %27 = vector.shape_cast %2 : vector<3x8x16xf32> to vector<1x3x8x16xf32>
    %28 = vector.shape_cast %26 : vector<1x1x8x16xi1> to vector<1x1x8x16xi1>
    %29 = vector.broadcast %28 : vector<1x1x8x16xi1> to vector<2x3x8x16xi1>
    %30 = vector.shape_cast %27 : vector<1x3x8x16xf32> to vector<1x3x8x16xf32>
    %31 = vector.broadcast %30 : vector<1x3x8x16xf32> to vector<2x3x8x16xf32>
    %32 = arith.select %29, %31, %25 : vector<2x3x8x16xi1>, vector<2x3x8x16xf32>
    %c0_7 = arith.constant 0 : index
    %c0_8 = arith.constant 0 : index
    %c0_9 = arith.constant 0 : index
    %c0_10 = arith.constant 0 : index
    %33 = vector.load %arg4[%c0_7, %c0_8, %c0_9, %c0_10] : memref<2x3x8x16xf32, #tpu.memory_space<vmem>>, vector<2x3x8x16xf32>
    tpu.vector_store %arg4[%c0_7, %c0_8, %c0_9, %c0_10], %32 {strides = array<i32>} : memref<2x3x8x16xf32, #tpu.memory_space<vmem>>, vector<2x3x8x16xf32>,
    return
  }
  func.func @transform_0(%arg0: i32, %arg1: i32) -> (i32, i32, i32, i32) {
    %c1_i32 = arith.constant 1 : i32
    %0 = arith.addi %c1_i32, %arg1 : i32
    %c0_i32 = arith.constant 0 : i32
    %1 = arith.addi %c0_i32, %arg0 : i32
    %c0_i32_0 = arith.constant 0 : i32
    %c0_i32_1 = arith.constant 0 : i32
    %c0_i32_2 = arith.constant 0 : i32
    return %c0_i32_0, %c0_i32_1, %0, %1 : i32, i32, i32, i32
  }
  func.func @transform_1(%arg0: i32, %arg1: i32) -> (i32, i32, i32) {
    %c0_i32 = arith.constant 0 : i32
    %0 = arith.addi %arg0, %c0_i32 : i32
    %c0_i32_0 = arith.constant 0 : i32
    %c0_i32_1 = arith.constant 0 : i32
    %1 = arith.maxsi %c0_i32_0, %0 : i32
    %2 = arith.minsi %c0_i32_1, %1 : i32
    %c0_i32_2 = arith.constant 0 : i32
    %c0_i32_3 = arith.constant 0 : i32
    %c0_i32_4 = arith.constant 0 : i32
    return %c0_i32_2, %c0_i32_3, %2 : i32, i32, i32
  }
  func.func @transform_2(%arg0: i32, %arg1: i32) -> (i32, i32, i32, i32) {
    %c1_i32 = arith.constant 1 : i32
    %0 = arith.addi %c1_i32, %arg1 : i32
    %c0_i32 = arith.constant 0 : i32
    %1 = arith.addi %c0_i32, %arg0 : i32
    %c0_i32_0 = arith.constant 0 : i32
    %c0_i32_1 = arith.constant 0 : i32
    %c0_i32_2 = arith.constant 0 : i32
    return %c0_i32_0, %c0_i32_1, %0, %1 : i32, i32, i32, i32
  }
}

</mosaic_0001>

<bundles_post_ra>
// kernel: _composer_forward.1
= control target key start
LH: loop header
LB: loop body
LE: loop exit
PB: predicated region body
PF: predicated region fallthrough
CT: control target
= control target key end

     0   :  { %v76_v0 = vlaneseq  ;;  %vm112_vm4 = vcmask 130048   ;;  %s267_s0 = inlined_call_operand.vmem [shape: f32[2,3,16,16], index: 0, kind: input, shape index: {}, may-alias: {0,2}]   ;;  %s268_s1 = inlined_call_operand.vmem [shape: f32[3,8,16], index: 1, kind: input, shape index: {}]   ;;  %s269_s2 = inlined_call_operand.vmem [shape: f32[2,3,16,16], index: 2, kind: output, shape index: {}, may-alias: {0,2}]  }
   0x1   :  { %v189_v4 = vld [vmem:[%s267_s0 + $0x8] sm:$0xff]  ;;  %v72_v5 = vld [vmem:[%s268_s1] sm:$0xff]  ;;  %v190_v6 = vld [vmem:[%s267_s0 + $0x18] sm:$0xff] }
   0x2   :  { %v77_v1 = vshrl.u32 %v76_v0, 7  ;;  %v82_v2 = vand.u32 127, %v76_v0  ;;  %v73_v7 = vld [vmem:[%s268_s1 + $0x8] sm:$0xff]  ;;  %v74_v9 = vld [vmem:[%s268_s1 + $0x10] sm:$0xff]  ;;  %v192_v10 = vld [vmem:[%s267_s0 + $0x38] sm:$0xff] }
   0x3   :  { %v191_v8 = vld [vmem:[%s267_s0 + $0x28] sm:$0xff]  ;;  %v194_v15 = vld [vmem:[%s267_s0 + $0x58] sm:$0xff] }
   0x4   :  { %v79_v3 = vadd.s32 8, %v77_v1  ;;  %vm88_vm0 = vcmp.ge.s32.totalorder %v82_v2, 4  ;;  %vm94_vm1 = vcmp.lt.s32.totalorder %v82_v2, 12  ;;  %v193_v11 = vld [vmem:[%s267_s0 + $0x48] sm:$0xff] }
   0x6   :  { %vm86_vm2 = vcmp.lt.s32.totalorder %v79_v3, 14 }
   0x7   :  { %vm93_vm3 = vmand %vm86_vm2, %vm88_vm0 }
   0x8   :  { %vm97_vm5 = vmand %vm93_vm3, %vm94_vm1 }
   0x9   :  { %v106_v12 = vsel %vm97_vm5, %v72_v5, %v189_v4  ;;  %v107_v13 = vsel %vm97_vm5, %v73_v7, %v190_v6  ;;  %v108_v14 = vsel %vm97_vm5, %v74_v9, %v191_v8  ;;  %v109_v16 = vsel %vm97_vm5, %v72_v5, %v192_v10 }
   0xa   :  { %113 = vst.msk [vmem:[#allocation3] sm:$0xff] %vm112_vm4, %v106_v12  ;;  %v110_v17 = vsel %vm97_vm5, %v73_v7, %v193_v11  ;;  %v111_v18 = vsel %vm97_vm5, %v74_v9, %v194_v15 }
   0xb   :  { %114 = vst.msk [vmem:[#allocation3 + $0x8] sm:$0xff] %vm112_vm4, %v107_v13 }
   0xc   :  { %115 = vst.msk [vmem:[#allocation3 + $0x10] sm:$0xff] %vm112_vm4, %v108_v14 }
   0xd   :  { %116 = vst.msk [vmem:[#allocation3 + $0x18] sm:$0xff] %vm112_vm4, %v109_v16 }
   0xe   :  { %117 = vst.msk [vmem:[#allocation3 + $0x20] sm:$0xff] %vm112_vm4, %v110_v17 }
   0xf   :  { %118 = vst.msk [vmem:[#allocation3 + $0x28] sm:$0xff] %vm112_vm4, %v111_v18 }
  0x11   :  { %v162_v19 = vld [vmem:[#allocation3] sm:$0xff] }
  0x12   :  { %195 = vst [vmem:[%s269_s2 + $0x8] sm:$0xff] %v162_v19  ;;  %v164_v20 = vld [vmem:[#allocation3 + $0x8] sm:$0xff] }
  0x13   :  { %196 = vst [vmem:[%s269_s2 + $0x18] sm:$0xff] %v164_v20  ;;  %v166_v21 = vld [vmem:[#allocation3 + $0x10] sm:$0xff] }
  0x14   :  { %197 = vst [vmem:[%s269_s2 + $0x28] sm:$0xff] %v166_v21  ;;  %v168_v22 = vld [vmem:[#allocation3 + $0x18] sm:$0xff] }
  0x15   :  { %198 = vst [vmem:[%s269_s2 + $0x38] sm:$0xff] %v168_v22  ;;  %v170_v23 = vld [vmem:[#allocation3 + $0x20] sm:$0xff] }
  0x16   :  { %199 = vst [vmem:[%s269_s2 + $0x48] sm:$0xff] %v170_v23  ;;  %v172_v24 = vld [vmem:[#allocation3 + $0x28] sm:$0xff] }
  0x17   :  { %200 = vst [vmem:[%s269_s2 + $0x58] sm:$0xff] %v172_v24 }

</bundles_post_ra>
